<compile_context>
chip_gen: v7x
topology: tpu7x:2x2x1
jax: 0.10.0
libtpu: 0.0.40
codegen_flags: <defaults>
</compile_context>

<pallas_src>
import jax
import jax.numpy as jnp
from jax.experimental import pallas as pl
from jax.experimental.pallas import tpu as pltpu


# ---------------------------------------------------------------------------
# Cache construction (mirrors RotaryEmbedding.__init__) + one-time kernel prep.
# ---------------------------------------------------------------------------
def build_rope_cache(dim, max_seq_len=1024):
    """cos_cached / sin_cached buffers, identical to the PyTorch module."""
    inv_freq = 1.0 / (10000.0 ** (jnp.arange(0, dim, 2, dtype=jnp.float32) / dim))
    t = jnp.arange(max_seq_len, dtype=jnp.float32)[:, None]           # (L, 1)
    freqs = t @ inv_freq[None, :]                                      # (L, dim/2)
    freqs = jnp.concatenate([freqs, freqs], axis=-1)                   # (L, dim)
    return jnp.cos(freqs), jnp.sin(freqs)


def prepare_rope_tables(cos_cached, sin_cached):
    """One-time (init-time) prep: fold rotate_half's negation into sin, keep f32.

    rotate_half(x) * sin == roll(x, D/2) * concat(-sin_lo, sin_hi), so the kernel
    only needs a cyclic lane rotation (XLU slot, effectively free) plus FMAs.
    Doing this once here removes all per-call table prep (extra XLA kernels and
    an (S, D) HBM round-trip per call in the previous version).
    """
    half = sin_cached.shape[-1] // 2
    sin_signed = jnp.concatenate([-sin_cached[:, :half], sin_cached[:, half:]], axis=-1)
    return cos_cached.astype(jnp.float32), sin_signed.astype(jnp.float32)


# ---------------------------------------------------------------------------
# Kernel.
# ---------------------------------------------------------------------------
def _make_rope_kernel(use_roll):
    def kernel(cos_ref, sin_ref, q_ref, k_ref, qo_ref, ko_ref):
        # cos / signed sin: (tS, D) f32 -> broadcast over batch (leading) and heads.
        cos = cos_ref[...][None, :, None, :]
        sin_s = sin_ref[...][None, :, None, :]
        half = cos.shape[-1] // 2

        def apply(x_ref, o_ref):
            # Compute in f32 (matches the reference's type promotion for bf16).
            x = x_ref[...].astype(jnp.float32)
            if use_roll:
                # rotate_half == lane roll by D/2 with the sign folded into sin_s.
                x_rot = pltpu.roll(x, shift=half, axis=3)
                o_ref[...] = (x * cos + x_rot * sin_s).astype(o_ref.dtype)
            else:
                # Two-halves form: no rotated full-width temporary, no concat.
                x_lo = x[..., :half]
                x_hi = x[..., half:]
                o_ref[..., :half] = (
                    x_lo * cos[..., :half] + x_hi * sin_s[..., :half]
                ).astype(o_ref.dtype)
                o_ref[..., half:] = (
                    x_hi * cos[..., half:] + x_lo * sin_s[..., half:]
                ).astype(o_ref.dtype)

        apply(q_ref, qo_ref)
        apply(k_ref, ko_ref)

    return kernel


# ---------------------------------------------------------------------------
# Tiling helpers.
# ---------------------------------------------------------------------------
def _round_up(x, m):
    return (x + m - 1) // m * m


def _vmem_capacity_bytes():
    """Per-core VMEM capacity; conservative fallback if the query fails."""
    try:
        cap = getattr(pltpu.get_tpu_info(), "vmem_capacity_bytes", None)
        if cap:
            return int(cap)
    except Exception:
        pass
    return 64 << 20   # v7x per-core size; safe on every generation


def _choose_seq_tile(S, B, Hq, Hk, D, in_itemsize, out_itemsize, vmem_cap):
    """Largest multiple-of-8 sequence tile that fits the VMEM budget while
    keeping enough grid steps to feed both v7x TensorCores / the pipeline."""
    budget = int(vmem_cap * 0.5)          # double-buffered blocks + spill headroom

    # Sublane padding of the (H, D) slabs inside VMEM blocks.
    sub_in = max(8, (8 * 4) // in_itemsize)
    sub_out = max(8, (8 * 4) // out_itemsize)
    hq_in, hk_in = _round_up(Hq, sub_in), _round_up(Hk, sub_in)
    hq_out, hk_out = _round_up(Hq, sub_out), _round_up(Hk, sub_out)

    per_row = (
        2 * (hq_in + hk_in) * D * in_itemsize      # q, k input blocks (x2 buffers)
        + 2 * (hq_out + hk_out) * D * out_itemsize  # q, k output blocks (x2 buffers)
        + 2 * 2 * D * 4                             # cos, sin blocks (x2 buffers)
        + 3 * (hq_in + hk_in) * D * 4               # f32 compute temporaries headroom
    )
    ts = max(8, budget // per_row)

    # Keep >= ~8 grid steps (when S allows) so megacore sharding and the
    # double-buffered pipeline both have work.
    min_steps = 8
    need_ns = pl.cdiv(min_steps, max(B, 1))
    if S // need_ns >= 8:
        ts = min(ts, S // need_ns)

    ts = min(ts, S, 2048)                  # diminishing returns beyond ~2K rows
    ts = max(8, (ts // 8) * 8)

    # Prefer an exact divisor of S near the cap (avoids a ragged, masked tail).
    for d in range(ts, max(8, ts // 2) - 1, -8):
        if S % d == 0:
            return d
    return ts


# ---------------------------------------------------------------------------
# Wrapper.
# ---------------------------------------------------------------------------
def rotary_embedding(q, k, cos_table, sin_signed_table, *, seq_block=None, out_dtype=None):
    """Apply RoPE to q, k of shape (B, S, H, D) using prepared tables
    (see prepare_rope_tables).  Returns (q_emb, k_emb)."""
    B, S, Hq, D = q.shape
    Bk, Sk, Hk, Dk = k.shape
    assert (B, S, D) == (Bk, Sk, Dk), "q and k must share batch, seq and head_dim"
    assert D % 2 == 0
    assert cos_table.shape[-1] == D and sin_signed_table.shape[-1] == D
    assert cos_table.shape[0] >= S, "sequence longer than the RoPE cache"

    # Output dtype follows type promotion (f32 for bf16 inputs), like the module.
    if out_dtype is None:
        qo_dtype = jnp.promote_types(q.dtype, cos_table.dtype)
        ko_dtype = jnp.promote_types(k.dtype, cos_table.dtype)
    else:
        qo_dtype = ko_dtype = jnp.dtype(out_dtype)

    vmem_cap = _vmem_capacity_bytes()
    vmem_limit = min(int(vmem_cap * 0.8), 120 << 20)

    # ---- sequence tiling -------------------------------------------------
    if S < 8:
        # Tiny sequences: a single block equal to the (sliced) table extent.
        cos_table = cos_table[:S]
        sin_signed_table = sin_signed_table[:S]
        tS = S
    elif seq_block is not None:
        assert seq_block % 8 == 0, "seq_block must be a multiple of 8"
        tS = min(seq_block, S)
    else:
        out_itemsize = max(jnp.dtype(qo_dtype).itemsize, jnp.dtype(ko_dtype).itemsize)
        tS = _choose_seq_tile(S, B, Hq, Hk, D, q.dtype.itemsize, out_itemsize, vmem_cap)
    n_s = pl.cdiv(S, tS)   # ragged tail block is masked by Pallas

    use_roll = (D % 128 == 0)   # lane-dense last dim -> XLU lane rotation is safe
    kernel = _make_rope_kernel(use_roll)

    # Grid: sequence blocks outer, batch inner.  cos/sin index_maps ignore the
    # batch index, so consecutive inner steps reuse the same table block and
    # Pallas skips the re-DMA (tables effectively stay VMEM-resident per s-block).
    grid_spec = pltpu.PrefetchScalarGridSpec(
        num_scalar_prefetch=0,
        grid=(n_s, B),
        in_specs=[
            pl.BlockSpec((tS, D), lambda s, b: (s, 0)),                # cos (f32)
            pl.BlockSpec((tS, D), lambda s, b: (s, 0)),                # signed sin (f32)
            pl.BlockSpec((1, tS, Hq, D), lambda s, b: (b, s, 0, 0)),   # q
            pl.BlockSpec((1, tS, Hk, D), lambda s, b: (b, s, 0, 0)),   # k
        ],
        out_specs=[
            pl.BlockSpec((1, tS, Hq, D), lambda s, b: (b, s, 0, 0)),   # q_emb
            pl.BlockSpec((1, tS, Hk, D), lambda s, b: (b, s, 0, 0)),   # k_emb
        ],
    )

    return pl.pallas_call(
        kernel,
        out_shape=(
            jax.ShapeDtypeStruct((B, S, Hq, D), qo_dtype),
            jax.ShapeDtypeStruct((B, S, Hk, D), ko_dtype),
        ),
        grid_spec=grid_spec,
        compiler_params=pltpu.CompilerParams(
            dimension_semantics=("parallel", "parallel"),
            vmem_limit_bytes=vmem_limit,
        ),
    )(cos_table, sin_signed_table, q, k)


class RotaryEmbedding:
    """JAX/Pallas equivalent of the PyTorch RotaryEmbedding module."""

    def __init__(self, dim, max_seq_len=1024):
        self.dim = dim
        self.max_seq_len = max_seq_len
        # Faithful module buffers.
        self.cos_cached, self.sin_cached = build_rope_cache(dim, max_seq_len)
        # Kernel tables prepared once (f32 cast + sign-folded sin), not per call.
        self._cos_table, self._sin_signed = prepare_rope_tables(
            self.cos_cached, self.sin_cached)

    def __call__(self, q, k, **kwargs):
        return rotary_embedding(q, k, self._cos_table, self._sin_signed, **kwargs)


# ---------------------------------------------------------------------------
# Pure-JAX reference mirroring the PyTorch forward.
# ---------------------------------------------------------------------------
def rotary_embedding_ref(q, k, cos_cached, sin_cached):
    S = q.shape[1]
    cos = cos_cached[:S, :][None, :, None, :]
    sin = sin_cached[:S, :][None, :, None, :]
    half = q.shape[-1] // 2

    def rotate_half(x):
        return jnp.concatenate([-x[..., half:], x[..., :half]], axis=-1)

    q_emb = q * cos + rotate_half(q) * sin
    k_emb = k * cos + rotate_half(k) * sin
    return q_emb, k_emb


if __name__ == "__main__":
    key = jax.random.PRNGKey(0)

    def run_case(idx, B, S, H, D, dtype, max_seq_len, seq_block=None):
        kq, kk = jax.random.split(jax.random.fold_in(key, idx))
        q = jax.random.normal(kq, (B, S, H, D), dtype=jnp.float32).astype(dtype)
        k = jax.random.normal(kk, (B, S, H, D), dtype=jnp.float32).astype(dtype)

        rope = RotaryEmbedding(D, max_seq_len)
        q_emb, k_emb = rope(q, k, seq_block=seq_block)
        jax.block_until_ready((q_emb, k_emb))

        q_ref, k_ref = rotary_embedding_ref(q, k, rope.cos_cached, rope.sin_cached)
        assert q_emb.dtype == q_ref.dtype and k_emb.dtype == k_ref.dtype
        assert jnp.allclose(q_emb, q_ref, atol=1e-5, rtol=1e-5)
        assert jnp.allclose(k_emb, k_ref, atol=1e-5, rtol=1e-5)

    # f32, lane-dense D (roll path), explicit seq tiling -> 2x2 grid (cos reuse across b).
    run_case(0, B=2, S=16, H=4, D=128, dtype=jnp.float32, max_seq_len=64, seq_block=8)
    # bf16 inputs -> f32 outputs via type promotion (matches the PyTorch module),
    # auto tile selection path.
    run_case(1, B=2, S=16, H=4, D=128, dtype=jnp.bfloat16, max_seq_len=64)
    # D not a multiple of 128 -> two-halves fallback (no slice+concat temporary).
    run_case(2, B=2, S=16, H=2, D=64, dtype=jnp.float32, max_seq_len=64, seq_block=8)

    print("KERNEL_OK")
</pallas_src>

<mosaic_0001>
module attributes {stable_mosaic.version = 11 : i64} {
  func.func @kernel(%arg0: i32, %arg1: i32, %arg2: memref<8x128xf32, #tpu.memory_space<vmem>>, %arg3: memref<8x128xf32, #tpu.memory_space<vmem>>, %arg4: memref<1x8x4x128xf32, #tpu.memory_space<vmem>>, %arg5: memref<1x8x4x128xf32, #tpu.memory_space<vmem>>, %arg6: memref<1x8x4x128xf32, #tpu.memory_space<vmem>>, %arg7: memref<1x8x4x128xf32, #tpu.memory_space<vmem>>) attributes {dimension_semantics = [#tpu.dimension_semantics<parallel>, #tpu.dimension_semantics<parallel>], iteration_bounds = array<i64: 2, 2>, scalar_prefetch = 0 : i64, scratch_operands = 0 : i64, tpu.core_type = #tpu.core_type<tc>, window_params = [{transform_indices = @transform_0, window_bounds = array<i64: 8, 128>}, {transform_indices = @transform_1, window_bounds = array<i64: 8, 128>}, {transform_indices = @transform_2, window_bounds = array<i64: 1, 8, 4, 128>}, {transform_indices = @transform_3, window_bounds = array<i64: 1, 8, 4, 128>}, {transform_indices = @transform_4, window_bounds = array<i64: 1, 8, 4, 128>}, {transform_indices = @transform_5, window_bounds = array<i64: 1, 8, 4, 128>}]} {
    %c0 = arith.constant 0 : index
    %c0_0 = arith.constant 0 : index
    %0 = vector.load %arg2[%c0, %c0_0] : memref<8x128xf32, #tpu.memory_space<vmem>>, vector<8x128xf32>
    %1 = vector.shape_cast %0 : vector<8x128xf32> to vector<1x8x1x128xf32>
    %c0_1 = arith.constant 0 : index
    %c0_2 = arith.constant 0 : index
    %2 = vector.load %arg3[%c0_1, %c0_2] : memref<8x128xf32, #tpu.memory_space<vmem>>, vector<8x128xf32>
    %3 = vector.shape_cast %2 : vector<8x128xf32> to vector<1x8x1x128xf32>
    %c0_3 = arith.constant 0 : index
    %c0_4 = arith.constant 0 : index
    %c0_5 = arith.constant 0 : index
    %c0_6 = arith.constant 0 : index
    %4 = vector.load %arg4[%c0_3, %c0_4, %c0_5, %c0_6] : memref<1x8x4x128xf32, #tpu.memory_space<vmem>>, vector<1x8x4x128xf32>
    %c64_i32 = arith.constant 64 : i32
    %5 = tpu.dynamic_rotate %4 by %c64_i32 dim 3 : vector<1x8x4x128xf32>, i32 -> vector<1x8x4x128xf32>
    %6 = vector.broadcast %1 : vector<1x8x1x128xf32> to vector<1x8x4x128xf32>
    %7 = arith.mulf %4, %6 : vector<1x8x4x128xf32>
    %8 = vector.broadcast %3 : vector<1x8x1x128xf32> to vector<1x8x4x128xf32>
    %9 = arith.mulf %5, %8 : vector<1x8x4x128xf32>
    %10 = arith.addf %7, %9 : vector<1x8x4x128xf32>
    %c0_7 = arith.constant 0 : index
    %c0_8 = arith.constant 0 : index
    %c0_9 = arith.constant 0 : index
    %c0_10 = arith.constant 0 : index
    %11 = vector.load %arg6[%c0_7, %c0_8, %c0_9, %c0_10] : memref<1x8x4x128xf32, #tpu.memory_space<vmem>>, vector<1x8x4x128xf32>
    tpu.vector_store %arg6[%c0_7, %c0_8, %c0_9, %c0_10], %10 {strides = array<i32>} : memref<1x8x4x128xf32, #tpu.memory_space<vmem>>, vector<1x8x4x128xf32>,
    %c0_11 = arith.constant 0 : index
    %c0_12 = arith.constant 0 : index
    %c0_13 = arith.constant 0 : index
    %c0_14 = arith.constant 0 : index
    %12 = vector.load %arg5[%c0_11, %c0_12, %c0_13, %c0_14] : memref<1x8x4x128xf32, #tpu.memory_space<vmem>>, vector<1x8x4x128xf32>
    %c64_i32_15 = arith.constant 64 : i32
    %13 = tpu.dynamic_rotate %12 by %c64_i32_15 dim 3 : vector<1x8x4x128xf32>, i32 -> vector<1x8x4x128xf32>
    %14 = vector.broadcast %1 : vector<1x8x1x128xf32> to vector<1x8x4x128xf32>
    %15 = arith.mulf %12, %14 : vector<1x8x4x128xf32>
    %16 = vector.broadcast %3 : vector<1x8x1x128xf32> to vector<1x8x4x128xf32>
    %17 = arith.mulf %13, %16 : vector<1x8x4x128xf32>
    %18 = arith.addf %15, %17 : vector<1x8x4x128xf32>
    %c0_16 = arith.constant 0 : index
    %c0_17 = arith.constant 0 : index
    %c0_18 = arith.constant 0 : index
    %c0_19 = arith.constant 0 : index
    %19 = vector.load %arg7[%c0_16, %c0_17, %c0_18, %c0_19] : memref<1x8x4x128xf32, #tpu.memory_space<vmem>>, vector<1x8x4x128xf32>
    tpu.vector_store %arg7[%c0_16, %c0_17, %c0_18, %c0_19], %18 {strides = array<i32>} : memref<1x8x4x128xf32, #tpu.memory_space<vmem>>, vector<1x8x4x128xf32>,
    return
  }
  func.func @transform_0(%arg0: i32, %arg1: i32) -> (i32, i32) {
    %c0_i32 = arith.constant 0 : i32
    %c0_i32_0 = arith.constant 0 : i32
    return %arg0, %c0_i32 : i32, i32
  }
  func.func @transform_1(%arg0: i32, %arg1: i32) -> (i32, i32) {
    %c0_i32 = arith.constant 0 : i32
    %c0_i32_0 = arith.constant 0 : i32
    return %arg0, %c0_i32 : i32, i32
  }
  func.func @transform_2(%arg0: i32, %arg1: i32) -> (i32, i32, i32, i32) {
    %c0_i32 = arith.constant 0 : i32
    %c0_i32_0 = arith.constant 0 : i32
    %c0_i32_1 = arith.constant 0 : i32
    return %arg1, %arg0, %c0_i32, %c0_i32_0 : i32, i32, i32, i32
  }
  func.func @transform_3(%arg0: i32, %arg1: i32) -> (i32, i32, i32, i32) {
    %c0_i32 = arith.constant 0 : i32
    %c0_i32_0 = arith.constant 0 : i32
    %c0_i32_1 = arith.constant 0 : i32
    return %arg1, %arg0, %c0_i32, %c0_i32_0 : i32, i32, i32, i32
  }
  func.func @transform_4(%arg0: i32, %arg1: i32) -> (i32, i32, i32, i32) {
    %c0_i32 = arith.constant 0 : i32
    %c0_i32_0 = arith.constant 0 : i32
    %c0_i32_1 = arith.constant 0 : i32
    return %arg1, %arg0, %c0_i32, %c0_i32_0 : i32, i32, i32, i32
  }
  func.func @transform_5(%arg0: i32, %arg1: i32) -> (i32, i32, i32, i32) {
    %c0_i32 = arith.constant 0 : i32
    %c0_i32_0 = arith.constant 0 : i32
    %c0_i32_1 = arith.constant 0 : i32
    return %arg1, %arg0, %c0_i32, %c0_i32_0 : i32, i32, i32, i32
  }
}

</mosaic_0001>

<bundles_post_ra>
// kernel: tpu_custom_call.1
= control target key start
LH: loop header
LB: loop body
LE: loop exit
PB: predicated region body
PF: predicated region fallthrough
CT: control target
= control target key end

     0   :  { %s2049_s0 = inlined_call_operand.hbm [shape: f32[64,128], index: 0, kind: input, shape index: {}]   ;;  %s2050_s1 = inlined_call_operand.hbm [shape: f32[64,128], index: 1, kind: input, shape index: {}]   ;;  %s2051_s2 = inlined_call_operand.hbm [shape: f32[2,16,4,128], index: 2, kind: input, shape index: {}]   ;;  %s2052_s3 = inlined_call_operand.hbm [shape: f32[2,16,4,128], index: 3, kind: input, shape index: {}]   ;;  %s2053_s4 = inlined_call_operand.hbm [shape: f32[2,16,4,128], index: 4, kind: output, shape index: {0}]   ;;  %s2054_s5 = inlined_call_operand.hbm [shape: f32[2,16,4,128], index: 5, kind: output, shape index: {1}]  }
   0x1   :  { %2069 = sst [smem:[#allocation26_spill]] %s2049_s0 }
   0x2   :  { %2070 = sst [smem:[#allocation27_spill]] %s2050_s1 }
   0x3   :  { %2071 = sst [smem:[#allocation28_spill]] %s2051_s2 }
   0x4   :  { %2072 = sst [smem:[#allocation29_spill]] %s2053_s4 }
   0x5   :  { %2073 = sst [smem:[#allocation30_spill]] %s2054_s5 }
   0x6   :  { %11 = vsyncpa [#allocation3], 0 }
   0x7   :  { %13 = vsyncpa [#allocation3 + $0x1], 0 }
   0x8   :  { %14 = vsyncpa [#allocation6], 0 }
   0x9   :  { %16 = vsyncpa [#allocation6 + $0x1], 0 }
   0xa   :  { %17 = vsyncpa [#allocation9], 0 }
   0xb   :  { %19 = vsyncpa [#allocation9 + $0x1], 0 }
   0xc   :  { %20 = vsyncpa [#allocation4], 0 }
   0xd   :  { %22 = vsyncpa [#allocation4 + $0x1], 0 }
   0xe   :  { %23 = vsyncpa [#allocation12], 0 }
   0xf   :  { %25 = vsyncpa [#allocation12 + $0x1], 0  ;;  %s1411_s18 = smov 0   ;;  %s1413_s19 = smov 0  }
  0x10   :  { %s1415_s20 = smov 0   ;;  %s1417_s21 = smov 0  }
  0x11   :  { %s1419_s22 = smov 0   ;;  %s1421_s23 = smov 0  }
  0x12   :  { %s1423_s24 = smov 0   ;;  %s1425_s25 = smov 0  }
  0x13   :  { %s1427_s26 = smov 0   ;;  %s1429_s27 = smov 0  }
  0x14   :  { %s1431_s28 = smov 0  }
  0x15 LB: > { %2074 = sst [smem:[#allocation19_spill]] %s1328_s18  ;;  %s1465_s29 = sadd.s32 4294967295, %s1368_s28   ;;  %s1368_s28 = sphi %s1431_s28, %s31_s28   ;;  %s1364_s27 = sphi %s1429_s27, %s2120_s27   ;;  %s1360_s26 = sphi %s1427_s26, %s2119_s26   ;;  %s1356_s25 = sphi %s1425_s25, %s2118_s25   ;;  %s1352_s24 = sphi %s1423_s24, %s2117_s24   ;;  %s1348_s23 = sphi %s1421_s23, %s2116_s23   ;;  %s1344_s22 = sphi %s1419_s22, %s2115_s22   ;;  %s1340_s21 = sphi %s1417_s21, %s2114_s21   ;;  %s1336_s20 = sphi %s1415_s20, %s2113_s20   ;;  %s1332_s19 = sphi %s1413_s19, %s2112_s19   ;;  %s1328_s18 = sphi %s1411_s18, %s2111_s18  }
  0x16   : > { %2075 = sst [smem:[#allocation20_spill]] %s1368_s28  ;;  %s921_s30 = sadd.s32 4294967294, %s1368_s28  }
  0x17   : > { %s40_s6 = sadd.s32 1, %s1360_s26  ;;  %s43_s7 = sadd.s32 1, %s1364_s27 }
  0x18   : > { %p41_p0 = scmp.ge.s32.totalorder %s40_s6, 2  ;;  %s50_s8 = sadd.s32 1, %s1348_s23 }
  0x19   : > { %p57_p1 = scmp.ne.s32.totalorder %s1348_s23, %s1344_s22  ;;  %p58_p2 = scmp.eq.s32.totalorder %s1368_s28, 0 }
  0x1a   : > { %s2122_s6 = smov (%p41_p0, %s40_s6), 0  ;;  %s2124_s7 = smov (!%p41_p0, %s43_s7), %s1364_s27 }
  0x1b   : > { %2076 = sst [smem:[#allocation21_spill]] %s2122_s6  ;;  %p1479_p3 = por %p58_p2, %p57_p1 }
  0x1c   : > { %p63_p4 = scmp.ne.s32.totalorder %s1344_s22, %s1340_s21  ;;  %p45_p5 = scmp.ge.s32.totalorder %s2124_s7, 2 }
  0x1d   : > { %p64_p6 = scmp.eq.s32.totalorder %s1465_s29, 0  ;;  %s99_s10 = ssub.s32 %s1360_s26, %s2122_s6 }
  0x1e   : > { %s104_s11 = sadd.s32 1, %s1336_s20  ;;  %s2126_s7 = smov (%p45_p5, %s2124_s7), 0 }
  0x1f   : > { %2078 = sst [smem:[#allocation22_spill]] %s2126_s7  ;;  %p1492_p7 = por %p64_p6, %p63_p4 }
  0x20   : > { %p111_p8 = scmp.ne.s32.totalorder %s1336_s20, %s1332_s19  ;;  %s47_s13 = ssub.s32 %s1364_s27, %s2126_s7 }
  0x21   : > { %s2079_s12 = scalar_select %p1492_p7, 1, 0 }
  0x22   : > { %p117_p9 = scmp.ne.s32.totalorder %s1332_s19, %s1328_s18  ;;  %p48_p10 = scmp.eq.s32.totalorder %s47_s13, 0 }
  0x23   : > { %s101_s14 = sor.u32 %s99_s10, %s47_s13  ;;  %p1504_p12 = por %p111_p8, %p58_p2 }
  0x24   : > { %p102_p11 = scmp.eq.s32.totalorder %s101_s14, 0  ;;  %p1516_p13 = por %p117_p9, %p64_p6 }
  0x25   : > { %s1509_s16 = scalar_select %p48_p10, %s1348_s23, %s50_s8  }
  0x26   : > { %s1512_s17 = scalar_select %p102_p11, %s1336_s20, %s104_s11  }
  0x27   : > { %2081 = sst [smem:[#allocation23_spill]] %s1509_s16  ;;  %p171_p0 = scmp.eq.s32.totalorder %s1465_s29, 3 }
  0x28   : > { %2082 = sst [smem:[#allocation24_spill]] %s1512_s17  ;;  %p177_p1 = scmp.eq.s32.totalorder %s921_s30, 3 }
  0x29   : > { %s2083_s21 = scalar_select %p1516_p13, 1, 0 }
  0x2a   : > { %p1521_p4 = por %p171_p0, %p111_p8  ;;  %p985_p2 = scmp.lt.s32.totalorder %s1368_s28, 4 }
  0x2b   : > { %p1526_p5 = por %p177_p1, %p117_p9  ;;  %s2057_s8 = sand.u32 1, %s1348_s23  }
  0x2c   : > { %s2084_s10 = scalar_select %p1521_p4, 1, 0 }
  0x2d   : > { %s2085_s13 = scalar_select %p1526_p5, 1, 0 }
  0x2e   : > { %s1533_s11 = sshll.u32 %s2057_s8, 3  ;;  %s2061_s14 = sshll.u32 %s1364_s27, 7 }
  0x2f   : > { %2086 = sst [smem:[#allocation25_spill]] %s2085_s13  ;;  %p1538_p6 = pnand %p985_p2, %p1479_p3 }
  0x30   : > { %s243_s30 = sand.u32 1, %s1368_s28   ;;  %s2088_s1 = sld [smem:[#allocation27_spill]] }
  0x31   : > { %s247_s8 = scalar_lea.vmem [#allocation5], %s1533_s11  ;;  %p1553_p3 = pnand %p985_p2, %p1504_p12 }
  0x32   : > { %s254_s13 = sshll.u32 %s247_s8, 4  ;;  %s1560_s18 = scalar_lea.sflag [#allocation6], %s243_s30  ;;  %s1557_s13 = int_to_ptr.vmem [resolvable:$true] %s254_s13 }
  0x33   : > { %p1084_p10 = pneg %p1538_p6 }
  0x36   : > { %s1548_s17 = scalar_lea.hbm %s2088_s1, %s2061_s14  ;;  %s1087_s15 = scalar_lea.hbm %s2088_s1, 1024 }
  0x37   : > { %s1082_s5 = scalar_lea.hbm %s1548_s17, 128  ;;  %p1088_p12 = scmp.lt.u32.totalorder %s1548_s17, %s2088_s1 }
  0x38   : > { %p1083_p9 = scmp.ne.s32.totalorder %s1548_s17, %s1082_s5  ;;  %p1089_p1 = scmp.lt.u32.totalorder %s1087_s15, %s1082_s5 }
  0x39   : > { %p1091_p8 = scmp.lt.u32.totalorder %s1082_s5, %s1548_s17 }
  0x3a   : > { %p1085_p11 = pnand %p1084_p10, %p1083_p9  ;;  %p1090_p2 = por %p1089_p1, %p1088_p12 }
  0x3c   : > { %p1086_p0 = pneg %p1085_p11  ;;  %p1092_p5 = por %p1091_p8, %p1090_p2 }
  0x3e   : > { %p1093_p4 = pnand %p1092_p5, %p1086_p0 }
  0x40   : > { %1096 = shalt.err (!%p1093_p4)
}
  0x41   : > { %s1097_s30 = scalar_lea.vmem %s1557_s13, 128  ;;  %s1370_s6 = smov [#allocation5]  }
  0x42   : > { %p1098_p9 = scmp.ne.s32.totalorder %s1557_s13, %s1097_s30  ;;  %s1102_s16 = sshll.u32 %s1370_s6, 4  ;;  %s1103_s16 = int_to_ptr.vmem [resolvable:$false] %s1102_s16 }
  0x43   : > { %s1104_s14 = scalar_lea.vmem %s1103_s16, 256  ;;  %p1105_p7 = scmp.lt.s32.totalorder %s1557_s13, %s1103_s16 }
  0x44   : > { %p1100_p11 = pnand %p1098_p9, %p1084_p10  ;;  %p1106_p12 = scmp.lt.s32.totalorder %s1104_s14, %s1097_s30 }
  0x46   : > { %p1101_p13 = pneg %p1100_p11  ;;  %p1107_p1 = por %p1106_p12, %p1105_p7 }
  0x48   : > { %p1108_p8 = pnand %p1107_p1, %p1101_p13 }
  0x4a   : > { %1111 = shalt.err (!%p1108_p8)
}
  0x4b   : > { %971 = dma.hbm_to_vmem [thread:$0]  (!%p1538_p6), %s1548_s17, 128, %s1557_s13, %s1560_s18  }
  0x4c   : > { %p305_p4 = scmp.lt.s32.totalorder %s1368_s28, 5  ;;  %p2090_p5 = scmp.ge.s32.totalorder %s1368_s28, 1 }
  0x4d   : > { %s2092_s15 = sshll.u32 %s1364_s27, 7  ;;  %s2093_s0 = sld [smem:[#allocation26_spill]] }
  0x4e   : > { %p1591_p0 = pnand %p2090_p5, %p305_p4  ;;  %s229_s16 = scalar_lea.vmem [#allocation2], %s1533_s11 }
  0x4f   : > { %s236_s14 = sshll.u32 %s229_s16, 4  ;;  %s2068_s1 = sand.u32 1, %s1336_s20   ;;  %s1604_s14 = int_to_ptr.vmem [resolvable:$true] %s236_s14 }
  0x50   : > { %s2091_s5 = scalar_select %p1591_p0, 1, 0 }
  0x51   : > { %s1608_s17 = sshll.u32 %s2068_s1, 5  ;;  %s2094_s13 = sand.u32 1, %s1348_s23  }
  0x52   : > { %s226_s28 = scalar_lea.sflag [#allocation3], %s2094_s13 }
  0x53   : > { %s1600_s6 = scalar_lea.hbm %s2093_s0, %s2092_s15  ;;  %s1117_s30 = scalar_lea.hbm %s2093_s0, 1024 }
  0x54   : > { %s1112_s4 = scalar_lea.hbm %s1600_s6, 128  ;;  %p1118_p9 = scmp.lt.u32.totalorder %s1600_s6, %s2093_s0 }
  0x55   : > { %p1113_p7 = scmp.ne.s32.totalorder %s1600_s6, %s1112_s4  ;;  %p1119_p11 = scmp.lt.u32.totalorder %s1117_s30, %s1112_s4 }
  0x56   : > { %p1121_p1 = scmp.lt.u32.totalorder %s1112_s4, %s1600_s6 }
  0x57   : > { %p1115_p13 = pnand %p1113_p7, %p1084_p10  ;;  %p1120_p12 = por %p1119_p11, %p1118_p9 }
  0x59   : > { %p1116_p2 = pneg %p1115_p13  ;;  %p1122_p8 = por %p1121_p1, %p1120_p12 }
  0x5b   : > { %p1123_p4 = pnand %p1122_p8, %p1116_p2 }
  0x5d   : > { %1126 = shalt.err (!%p1123_p4)
}
  0x5e   : > { %s1127_s13 = scalar_lea.vmem %s1604_s14, 128  ;;  %s1371_s15 = smov [#allocation2]  }
  0x5f   : > { %p1128_p5 = scmp.ne.s32.totalorder %s1604_s14, %s1127_s13  ;;  %s1132_s8 = sshll.u32 %s1371_s15, 4  ;;  %s1133_s8 = int_to_ptr.vmem [resolvable:$false] %s1132_s8 }
  0x60   : > { %s1134_s11 = scalar_lea.vmem %s1133_s8, 256  ;;  %p1135_p0 = scmp.lt.s32.totalorder %s1604_s14, %s1133_s8 }
  0x61   : > { %p1130_p7 = pnand %p1128_p5, %p1084_p10  ;;  %p1136_p9 = scmp.lt.s32.totalorder %s1134_s11, %s1127_s13 }
  0x63   : > { %p1131_p13 = pneg %p1130_p7  ;;  %p1137_p11 = por %p1136_p9, %p1135_p0 }
  0x65   : > { %p1138_p12 = pnand %p1137_p11, %p1131_p13 }
  0x67   : > { %1141 = shalt.err (!%p1138_p12)
}
  0x68   : > { %968 = dma.hbm_to_vmem [thread:$0]  (!%p1538_p6), %s1600_s6, 128, %s1604_s14, %s226_s28  }
  0x69   : > { %s929_s4 = sshll.u32 %s1364_s27, 3  ;;  %s930_s30 = sshll.u32 %s1360_s26, 4 }
  0x6a   : > { %s265_s16 = scalar_lea.vmem [#allocation7], %s1608_s17  ;;  %s1638_s1 = sadd.s32 %s930_s30, %s929_s4 }
  0x6b   : > { %s274_s15 = sshll.u32 %s265_s16, 4  ;;  %s931_s13 = sshll.u32 %s1638_s1, 6  ;;  %s1640_s15 = int_to_ptr.vmem [resolvable:$true] %s274_s15 }
  0x6c   : > { %s2095_s2 = sld [smem:[#allocation28_spill]]  ;;  %p1144_p10 = pneg %p1553_p3 }
  0x72   : > { %s1648_s11 = scalar_lea.hbm %s2095_s2, %s931_s13  ;;  %s1147_s4 = scalar_lea.hbm %s2095_s2, 2048 }
  0x73   : > { %s1142_s28 = scalar_lea.hbm %s1648_s11, 512  ;;  %p1148_p1 = scmp.lt.u32.totalorder %s1648_s11, %s2095_s2 }
  0x74   : > { %p1143_p6 = scmp.ne.s32.totalorder %s1648_s11, %s1142_s28  ;;  %p1149_p8 = scmp.lt.u32.totalorder %s1147_s4, %s1142_s28 }
  0x75   : > { %p1151_p5 = scmp.lt.u32.totalorder %s1142_s28, %s1648_s11 }
  0x76   : > { %p1145_p0 = pnand %p1144_p10, %p1143_p6  ;;  %p1150_p4 = por %p1149_p8, %p1148_p1 }
  0x78   : > { %p1146_p2 = pneg %p1145_p0  ;;  %p1152_p7 = por %p1151_p5, %p1150_p4 }
  0x7a   : > { %p1153_p13 = pnand %p1152_p7, %p1146_p2 }
  0x7c   : > { %1156 = shalt.err (!%p1153_p13)
}
  0x7d   : > { %s1157_s7 = scalar_lea.vmem %s1640_s15, 512  ;;  %s1372_s8 = smov [#allocation7]  }
  0x7e   : > { %p1158_p9 = scmp.ne.s32.totalorder %s1640_s15, %s1157_s7  ;;  %s1162_s6 = sshll.u32 %s1372_s8, 4  ;;  %s1163_s6 = int_to_ptr.vmem [resolvable:$false] %s1162_s6 }
  0x7f   : > { %s1164_s14 = scalar_lea.vmem %s1163_s6, 1024  ;;  %p1165_p6 = scmp.lt.s32.totalorder %s1640_s15, %s1163_s6 }
  0x80   : > { %p1160_p11 = pnand %p1158_p9, %p1144_p10  ;;  %p1166_p0 = scmp.lt.s32.totalorder %s1164_s14, %s1157_s7 }
  0x82   : > { %p1161_p12 = pneg %p1160_p11  ;;  %p1167_p1 = por %p1166_p0, %p1165_p6 }
  0x84   : > { %p1168_p8 = pnand %p1167_p1, %p1161_p12 }
  0x86   : > { %1171 = shalt.err (!%p1168_p8)
}
  0x87   : > { %s1373_s28 = smov 64   ;;  %s1374_s4 = smov 4  }
  0x88   : > { %974 = dma.hbm_to_vmem [thread:$0]  (!%p1553_p3), %s1648_s11, 512, %s1640_s15, %s1560_s18, %s1373_s28, %s1373_s28, %s1374_s4  }
  0x89   : > { %s1684_s7 = scalar_lea.hbm %s2052_s3, %s931_s13  ;;  %s288_s8 = scalar_lea.vmem [#allocation8], %s1608_s17 }
  0x8a   : > { %s297_s6 = sshll.u32 %s288_s8, 4  ;;  %s2096_s14 = sand.u32 1, %s1336_s20   ;;  %s1687_s6 = int_to_ptr.vmem [resolvable:$true] %s297_s6 }
  0x8b   : > { %s1691_s0 = scalar_lea.sflag [#allocation9], %s2096_s14  ;;  %s1172_s2 = scalar_lea.hbm %s1684_s7, 512 }
  0x8c   : > { %p1173_p2 = scmp.ne.s32.totalorder %s1684_s7, %s1172_s2  ;;  %s1177_s15 = scalar_lea.hbm %s2052_s3, 2048 }
  0x8d   : > { %p1178_p7 = scmp.lt.u32.totalorder %s1684_s7, %s2052_s3  ;;  %p1179_p13 = scmp.lt.u32.totalorder %s1177_s15, %s1172_s2 }
  0x8e   : > { %p1175_p4 = pnand %p1173_p2, %p1144_p10  ;;  %p1181_p11 = scmp.lt.u32.totalorder %s1172_s2, %s1684_s7 }
  0x8f   : > { %p1180_p9 = por %p1179_p13, %p1178_p7 }
  0x90   : > { %p1176_p5 = pneg %p1175_p4 }
  0x91   : > { %p1182_p12 = por %p1181_p11, %p1180_p9 }
  0x93   : > { %p1183_p6 = pnand %p1182_p12, %p1176_p5 }
  0x95   : > { %1186 = shalt.err (!%p1183_p6)
}
  0x96   : > { %s1187_s17 = scalar_lea.vmem %s1687_s6, 512  ;;  %s1375_s30 = smov [#allocation8]  }
  0x97   : > { %p1188_p0 = scmp.ne.s32.totalorder %s1687_s6, %s1187_s17  ;;  %s1192_s16 = sshll.u32 %s1375_s30, 4  ;;  %s1193_s16 = int_to_ptr.vmem [resolvable:$false] %s1192_s16 }
  0x98   : > { %s1194_s8 = scalar_lea.vmem %s1193_s16, 1024  ;;  %p1195_p2 = scmp.lt.s32.totalorder %s1687_s6, %s1193_s16 }
  0x99   : > { %p1190_p1 = pnand %p1188_p0, %p1144_p10  ;;  %p1196_p4 = scmp.lt.s32.totalorder %s1194_s8, %s1187_s17 }
  0x9b   : > { %p1191_p8 = pneg %p1190_p1  ;;  %p1197_p7 = por %p1196_p4, %p1195_p2 }
  0x9d   : > { %p1198_p13 = pnand %p1197_p7, %p1191_p8 }
  0x9f   : > { %1201 = shalt.err (!%p1198_p13)
}
  0xa0   : > { %977 = dma.hbm_to_vmem [thread:$0]  (!%p1553_p3), %s1684_s7, 512, %s1687_s6, %s1691_s0, %s1373_s28, %s1373_s28, %s1374_s4  }
  0xa1   : > { %p2097_p10 = scmp.ne.s32.totalorder %s2091_s5, 0 }
  0xa2   : > { %s311_s2 = sand.u32 (!%p2097_p10), 1, %s1344_s22   ;;  %p2098_p5 = scmp.ne.s32.totalorder (!%p2097_p10), %s2079_s12, 0 }
  0xa3   : > { %309 = sbr.rel (%p2097_p10) target bundleno = 352 (0x160), region = 36  ;;  %s1723_s14 = sshll.u32 (!%p2097_p10), %s311_s2, 3 }
  0xa4   : > { %s312_s1 = scalar_lea.sflag (!%p2097_p10), [#allocation3], %s311_s2  ;;  %s315_s18 = scalar_lea.vmem (!%p2097_p10), [#allocation2], %s1723_s14 }
  0xaa   : > { %1303 = dma.done.wait (%p2098_p5), %s312_s1, 128  }
  0xab   : > { %1305 = vsyncadd (%p2098_p5), %s312_s1, 4294967168  ;;  %s320_s0 = sand.u32 1, %s1465_s29   ;;  %s324_s5 = scalar_lea.vmem [#allocation5], %s1723_s14 }
  0xac   : > { %s321_s9 = scalar_lea.sflag [#allocation6], %s320_s0 }
  0xad   : > { %1307 = dma.done.wait (%p2098_p5), %s321_s9, 128  }
  0xae   : > { %1309 = vsyncadd (%p2098_p5), %s321_s9, 4294967168  ;;  %s1737_s28 = sand.u32 1, %s1332_s19   ;;  %p2099_p3 = scmp.ne.s32.totalorder %s2083_s21, 0 }
  0xaf   : > { %s1740_s4 = sshll.u32 %s1737_s28, 5 }
  0xb0   : > { %s333_s7 = scalar_lea.vmem [#allocation7], %s1740_s4 }
  0xb1   : > { %1311 = dma.done.wait (%p2099_p3), %s321_s9, 512  }
  0xb2   : > { %1313 = vsyncadd (%p2099_p3), %s321_s9, 4294966784  ;;  %s339_s29 = scalar_lea.sflag [#allocation9], %s1737_s28  ;;  %s1749_s12 = scalar_lea.vmem [#allocation8], %s1740_s4 }
  0xb3   : > { %1315 = dma.done.wait (%p2099_p3), %s339_s29, 512  }
  0xb4   : > { %1317 = vsyncadd (%p2099_p3), %s339_s29, 4294966784  ;;  %v1755_v0 = vld [vmem:[%s333_s7 + $0x8] sm:$0xf]  ;;  %v1757_v1 = vld [vmem:[%s333_s7] sm:$0xf]  ;;  %s1376_s6 = smov 64   ;;  %v399_v18 = vlaneseq }
  0xb5   : > { %507 = vrot.lane.b32.xlu1 %v1755_v0, %s1376_s6  ;;  %503 = vrot.lane.b32.xlu0 %v1757_v1, %s1376_s6  ;;  %v1763_v2 = vld [vmem:[%s333_s7 + $0xc] sm:$0xf]  ;;  %v1765_v3 = vld [vmem:[%s333_s7 + $0x4] sm:$0xf]  ;;  %v1377_v16 = vmov 1966171168  }
  0xb6   : > { %v1771_v4 = vld [vmem:[%s333_s7 + $0x14] sm:$0xf]  ;;  %v1773_v5 = vld [vmem:[%s333_s7 + $0x10] sm:$0xf]  ;;  %v1779_v6 = vld [vmem:[%s333_s7 + $0x1c] sm:$0xf]  ;;  %v397_v17 = vunpack.c.l.s4 %v1377_v16 }
  0xb7   : > { %v1781_v7 = vld [vmem:[%s333_s7 + $0x18] sm:$0xf]  ;;  %v1788_v8 = vld [vmem:[%s1749_s12 + $0x4] sm:$0xf]  ;;  %v1791_v9 = vld [vmem:[%s1749_s12] sm:$0xf] }
  0xb8   : > { %v1798_v10 = vld [vmem:[%s1749_s12 + $0xc] sm:$0xf]  ;;  %v1801_v11 = vld [vmem:[%s1749_s12 + $0x8] sm:$0xf]  ;;  %v1808_v12 = vld [vmem:[%s1749_s12 + $0x14] sm:$0xf]  ;;  %v398_v19 = vunpack.c.0.s8 %v397_v17 }
  0xb9   : > { %509 = vrot.lane.b32.xlu1 %v1763_v2, %s1376_s6  ;;  %505 = vrot.lane.b32.xlu0 %v1765_v3, %s1376_s6  ;;  %v1811_v13 = vld [vmem:[%s1749_s12 + $0x10] sm:$0xf]  ;;  %v1818_v14 = vld [vmem:[%s1749_s12 + $0x1c] sm:$0xf]  ;;  %v400_v20 = vshrl.u32 %v399_v18, 7  ;;  %s1864_s21 = scalar_lea.vmem [#allocation10], %s1740_s4 }
  0xba   : > { %v1821_v15 = vld [vmem:[%s1749_s12 + $0x18] sm:$0xf]  ;;  %v393_v22 = vld [vmem:[%s315_s18] sm:$0xff]  ;;  %s945_s15 = sshll.u32 %s1356_s25, 3  ;;  %s946_s13 = sshll.u32 %s1352_s24, 4 }
  0xbb   : > { %v401_v21 = vsub.s32 %v398_v19, %v400_v20  ;;  %v444_v23 = vld [vmem:[%s324_s5] sm:$0xff]  ;;  %v395_v26 = vcombine.high %v393_v22, %v393_v22  ;;  %v521_v33 = vsub.s32 0, %v400_v20  ;;  %s1890_s24 = sadd.s32 %s946_s13, %s945_s15  ;;  %s708_s25 = sshll.u32 %s1864_s21, 4  ;;  %s1902_s25 = int_to_ptr.vmem [resolvable:$true] %s708_s25 }
  0xbc   : > { %v446_v31 = vcombine.high %v444_v23, %v444_v23  ;;  %s947_s11 = sshll.u32 %s1890_s24, 6  ;;  %s2100_s16 = sld [smem:[#allocation29_spill]] }
  0xbd   : > { %513 = vrot.lane.b32.xlu1 %v1771_v4, %s1376_s6  ;;  %511 = vrot.lane.b32.xlu0 %v1773_v5, %s1376_s6  ;;  %v402_v24 = vrot.slane %v393_v22, %v401_v21  ;;  %v453_v25 = vrot.slane %v444_v23, %v401_v21  ;;  %v409_v32 = vrot.slane %v395_v26, %v401_v21  ;;  %s688_s2 = scalar_lea.sflag [#allocation4], %s1737_s28  ;;  %s1202_s14 = scalar_lea.vmem %s1902_s25, 512 }
  0xbe   : > { %v460_v38 = vrot.slane %v446_v31, %v401_v21  ;;  %p1203_p9 = scmp.ne.s32.totalorder %s1902_s25, %s1202_s14  ;;  %p2101_p11 = scmp.ne.s32.totalorder %s2084_s10, 0 }
  0xbf   : > { %v418_v27 = vrot.slane %v402_v24, %v401_v21  ;;  %v410_v28 = vcombine.high %v402_v24, %v402_v24  ;;  %v469_v29 = vrot.slane %v453_v25, %v401_v21  ;;  %v461_v30 = vcombine.high %v453_v25, %v453_v25  ;;  %s1378_s1 = smov [#allocation10]  }
  0xc0   : > { %v411_v39 = vcombine.high %v409_v32, %v409_v32  ;;  %v462_v46 = vcombine.high %v460_v38, %v460_v38  ;;  %v425_v49 = vrot.slane %v409_v32, %v401_v21  ;;  %v476_v56 = vrot.slane %v460_v38, %v401_v21  ;;  %p1204_p12 = pnand %p1203_p9, %p2101_p11  ;;  %s1206_s18 = sshll.u32 %s1378_s1, 4  ;;  %s1207_s18 = int_to_ptr.vmem [resolvable:$false] %s1206_s18 }
  0xc1   : > { %517 = vrot.lane.b32.xlu1 %v1779_v6, %s1376_s6  ;;  %515 = vrot.lane.b32.xlu0 %v1781_v7, %s1376_s6  ;;  %v440_v34 = vcombine.high %v418_v27, %v418_v27  ;;  %v432_v35 = vrot.slane %v410_v28, %v401_v21  ;;  %v491_v36 = vcombine.high %v469_v29, %v469_v29  ;;  %s1208_s0 = scalar_lea.vmem %s1207_s18, 1024  ;;  %p1209_p0 = scmp.lt.s32.totalorder %s1902_s25, %s1207_s18 }
  0xc2   : > { %v483_v37 = vrot.slane %v461_v30, %v401_v21  ;;  %v1833_v41 = vrot.slane %v418_v27, %v521_v33  ;;  %v1837_v44 = vrot.slane %v469_v29, %v521_v33  ;;  %v439_v48 = vrot.slane %v411_v39, %v401_v21  ;;  %s1913_s8 = scalar_lea.hbm %s2100_s16, %s947_s11  ;;  %p1205_p6 = pneg %p1204_p12 }
  0xc3   : > { %v1831_v40 = vrot.slane %v440_v34, %v521_v33  ;;  %v442_v42 = vcombine.high %v432_v35, %v432_v35  ;;  %v1835_v43 = vrot.slane %v491_v36, %v521_v33  ;;  %v1839_v47 = vrot.slane %v432_v35, %v521_v33  ;;  %p1210_p1 = scmp.lt.s32.totalorder %s1208_s0, %s1202_s14 }
  0xc4   : > { %v493_v45 = vcombine.high %v483_v37, %v483_v37  ;;  %v559_v51 = vmul.f32 %v1833_v41, %v1757_v1  ;;  %v1847_v55 = vrot.slane %v483_v37, %v521_v33  ;;  %v490_v60 = vrot.slane %v462_v46, %v401_v21 }
  0xc5   : > { %641 = vrot.lane.b32.xlu1 %v1788_v8, %s1376_s6  ;;  %639 = vrot.lane.b32.xlu0 %v1791_v9, %s1376_s6  ;;  %v561_v50 = vmul.f32 %v1831_v40, %v1755_v0  ;;  %v1845_v52 = vrot.slane %v442_v42, %v521_v33  ;;  %v560_v61 = vmul.f32 %v1839_v47, %v1765_v3  ;;  %p1211_p8 = por %p1210_p1, %p1209_p0 }
  0xc6   : > { %v1851_v59 = vrot.slane %v493_v45, %v521_v33  ;;  %v1855_v62 = vrot.slane %v439_v48, %v521_v33  ;;  %v1857_v63 = vrot.slane %v425_v49, %v521_v33  ;;  %v441_v0 = vcombine.high %v425_v49, %v425_v49 }
  0xc7   : > { %v562_v1 = vmul.f32 %v1845_v52, %v1763_v2  ;;  %v443_v16 = vcombine.high %v439_v48, %v439_v48  ;;  %v1861_v22 = vrot.slane %v476_v56, %v521_v33  ;;  %v492_v21 = vcombine.high %v476_v56, %v476_v56  ;;  %p1212_p2 = pnand %p1211_p8, %p1205_p6 }
  0xc8   : > { %v1870_v23 = vrot.slane %v490_v60, %v521_v33  ;;  %v494_v24 = vcombine.high %v490_v60, %v490_v60  ;;  %v563_v25 = vmul.f32 %v1857_v63, %v1773_v5  ;;  %v1874_v26 = vrot.slane %v441_v0, %v521_v33 }
  0xc9   : > { %645 = vrot.lane.b32.xlu1 %v1798_v10, %s1376_s6  ;;  %643 = vrot.lane.b32.xlu0 %v1801_v11, %s1376_s6  ;;  %v564_v27 = vmul.f32 %v1855_v62, %v1771_v4  ;;  %v1880_v28 = vrot.slane %v443_v16, %v521_v33  ;;  %v1888_v36 = vrot.slane %v492_v21, %v521_v33 }
  0xca   : > { %v1886_v35 = vrot.slane %v494_v24, %v521_v33  ;;  %v565_v37 = vmul.f32 %v1874_v26, %v1781_v7  ;;  %v655_v7 = vmul.f32 %v1791_v9, %v1833_v41 }
  0xcb   : > { %v566_v4 = vmul.f32 %v1880_v28, %v1779_v6  ;;  %v656_v6 = vmul.f32 %v1788_v8, %v1839_v47 }
  0xcd   : > { %649 = vrot.lane.b32.xlu1 %v1808_v12, %s1376_s6  ;;  %647 = vrot.lane.b32.xlu0 %v1811_v13, %s1376_s6 }
  0xd1   : > { %653 = vrot.lane.b32.xlu1 %v1818_v14, %s1376_s6  ;;  %651 = vrot.lane.b32.xlu0 %v1821_v15, %s1376_s6 }
 0x127   : > { %v508_v53 = vpop.permute.xlu1 %507  ;;  %v504_v54 = vpop.permute.xlu0 %503 }
 0x128   : > { %v609_v57 = vmul.f32 %v1835_v43, %v508_v53  ;;  %v607_v58 = vmul.f32 %v1837_v44, %v504_v54 }
 0x12a   : > { %v617_v17 = vadd.f32 %v609_v57, %v561_v50  ;;  %v615_v18 = vadd.f32 %v607_v58, %v559_v51 }
 0x12b   : > { %v510_v19 = vpop.permute.xlu1 %509  ;;  %v506_v20 = vpop.permute.xlu0 %505 }
 0x12c   : > { %625 = vst [vmem:[%s1864_s21 + $0x8] sm:$0xf] %v617_v17  ;;  %623 = vst [vmem:[%s1864_s21] sm:$0xf] %v615_v18  ;;  %v610_v2 = vmul.f32 %v1851_v59, %v510_v19  ;;  %v608_v3 = vmul.f32 %v1847_v55, %v506_v20 }
 0x12e   : > { %v618_v29 = vadd.f32 %v610_v2, %v562_v1  ;;  %v616_v30 = vadd.f32 %v608_v3, %v560_v61 }
 0x12f   : > { %v514_v31 = vpop.permute.xlu1 %513  ;;  %v512_v32 = vpop.permute.xlu0 %511 }
 0x130   : > { %626 = vst [vmem:[%s1864_s21 + $0xc] sm:$0xf] %v618_v29  ;;  %624 = vst [vmem:[%s1864_s21 + $0x4] sm:$0xf] %v616_v30  ;;  %v612_v5 = vmul.f32 %v1870_v23, %v514_v31  ;;  %v611_v34 = vmul.f32 %v1861_v22, %v512_v32 }
 0x132   : > { %v620_v38 = vadd.f32 %v612_v5, %v564_v27  ;;  %v619_v39 = vadd.f32 %v611_v34, %v563_v25 }
 0x133   : > { %v518_v42 = vpop.permute.xlu1 %517  ;;  %v516_v45 = vpop.permute.xlu0 %515 }
 0x134   : > { %628 = vst [vmem:[%s1864_s21 + $0x14] sm:$0xf] %v620_v38  ;;  %627 = vst [vmem:[%s1864_s21 + $0x10] sm:$0xf] %v619_v39  ;;  %v614_v33 = vmul.f32 %v1886_v35, %v518_v42  ;;  %v613_v46 = vmul.f32 %v1888_v36, %v516_v45 }
 0x136   : > { %v622_v48 = vadd.f32 %v614_v33, %v566_v4  ;;  %v621_v49 = vadd.f32 %v613_v46, %v565_v37 }
 0x137   : > { %v642_v50 = vpop.permute.xlu1 %641  ;;  %v640_v51 = vpop.permute.xlu0 %639 }
 0x138   : > { %630 = vst [vmem:[%s1864_s21 + $0x1c] sm:$0xf] %v622_v48  ;;  %629 = vst [vmem:[%s1864_s21 + $0x18] sm:$0xf] %v621_v49  ;;  %v664_v53 = vmul.f32 %v642_v50, %v1847_v55  ;;  %v663_v8 = vmul.f32 %v640_v51, %v1837_v44 }
 0x139   : > { %1215 = shalt.err (!%p1212_p2)
}
 0x13a   : > { %s1216_s9 = scalar_lea.hbm %s1913_s8, 512  ;;  %s1220_s29 = scalar_lea.hbm %s2100_s16, 2048 }
 0x13b   : > { %p1217_p4 = scmp.ne.s32.totalorder %s1913_s8, %s1216_s9  ;;  %p1221_p10 = scmp.lt.u32.totalorder %s1913_s8, %s2100_s16 }
 0x13c   : > { %p1222_p5 = scmp.lt.u32.totalorder %s1220_s29, %s1216_s9  ;;  %p1224_p9 = scmp.lt.u32.totalorder %s1216_s9, %s1913_s8 }
 0x13d   : > { %p1218_p7 = pnand %p1217_p4, %p2101_p11 }
 0x13e   : > { %p1223_p3 = por %p1222_p5, %p1221_p10 }
 0x13f   : > { %p1219_p13 = pneg %p1218_p7 }
 0x140   : > { %p1225_p12 = por %p1224_p9, %p1223_p3 }
 0x142   : > { %p1226_p6 = pnand %p1225_p12, %p1219_p13 }
 0x144   : > { %1229 = shalt.err (!%p1226_p6)
}
 0x145   : > { %s1379_s15 = smov 4   ;;  %v658_v9 = vmul.f32 %v1798_v10, %v1845_v52  ;;  %v657_v41 = vmul.f32 %v1801_v11, %v1831_v40  ;;  %v672_v44 = vadd.f32 %v664_v53, %v656_v6  ;;  %v671_v47 = vadd.f32 %v663_v8, %v655_v7  ;;  %v646_v54 = vpop.permute.xlu1 %645  ;;  %v644_v55 = vpop.permute.xlu0 %643  ;;  %s1951_s13 = scalar_lea.vmem [#allocation11], %s1740_s4 }
 0x146   : > { %961 = dma.vmem_to_hbm [thread:$0]  (%p2101_p11), %s1902_s25, 512, %s1913_s8, %s688_s2, %s1376_s6, %s1376_s6, %s1379_s15   ;;  %v666_v56 = vmul.f32 %v646_v54, %v1851_v59  ;;  %v665_v10 = vmul.f32 %v644_v55, %v1835_v43  ;;  %v660_v11 = vmul.f32 %v1808_v12, %v1855_v62  ;;  %v659_v40 = vmul.f32 %v1811_v13, %v1857_v63 }
 0x147   : > { %680 = vst [vmem:[%s1951_s13 + $0x4] sm:$0xf] %v672_v44  ;;  %679 = vst [vmem:[%s1951_s13] sm:$0xf] %v671_v47  ;;  %v662_v12 = vmul.f32 %v1818_v14, %v1880_v28  ;;  %v661_v13 = vmul.f32 %v1821_v15, %v1874_v26  ;;  %s726_s4 = sshll.u32 %s1951_s13, 4  ;;  %s2102_s30 = sld [smem:[#allocation30_spill]]  ;;  %s1974_s4 = int_to_ptr.vmem [resolvable:$true] %s726_s4 }
 0x148   : > { %v674_v52 = vadd.f32 %v666_v56, %v658_v9  ;;  %v673_v57 = vadd.f32 %v665_v10, %v657_v41  ;;  %s693_s2 = scalar_lea.sflag [#allocation12], %s1737_s28  ;;  %s1230_s14 = scalar_lea.vmem %s1974_s4, 512 }
 0x149   : > { %v650_v58 = vpop.permute.xlu1 %649  ;;  %v648_v60 = vpop.permute.xlu0 %647  ;;  %p1231_p0 = scmp.ne.s32.totalorder %s1974_s4, %s1230_s14  ;;  %s1380_s1 = smov [#allocation11]  }
 0x14a   : > { %682 = vst [vmem:[%s1951_s13 + $0xc] sm:$0xf] %v674_v52  ;;  %681 = vst [vmem:[%s1951_s13 + $0x8] sm:$0xf] %v673_v57  ;;  %v668_v61 = vmul.f32 %v650_v58, %v1870_v23  ;;  %v667_v59 = vmul.f32 %v648_v60, %v1861_v22  ;;  %s1234_s18 = sshll.u32 %s1380_s1, 4  ;;  %s1235_s18 = int_to_ptr.vmem [resolvable:$false] %s1234_s18 }
 0x14b   : > { %p1232_p1 = pnand %p1231_p0, %p2101_p11  ;;  %s1236_s0 = scalar_lea.vmem %s1235_s18, 1024 }
 0x14c   : > { %v676_v43 = vadd.f32 %v668_v61, %v660_v11  ;;  %v675_v62 = vadd.f32 %v667_v59, %v659_v40  ;;  %p1237_p2 = scmp.lt.s32.totalorder %s1974_s4, %s1235_s18  ;;  %p1238_p4 = scmp.lt.s32.totalorder %s1236_s0, %s1230_s14 }
 0x14d   : > { %v654_v63 = vpop.permute.xlu1 %653  ;;  %v652_v0 = vpop.permute.xlu0 %651  ;;  %s1981_s8 = scalar_lea.hbm %s2102_s30, %s947_s11  ;;  %p1233_p8 = pneg %p1232_p1 }
 0x14e   : > { %684 = vst [vmem:[%s1951_s13 + $0x14] sm:$0xf] %v676_v43  ;;  %683 = vst [vmem:[%s1951_s13 + $0x10] sm:$0xf] %v675_v62  ;;  %v670_v1 = vmul.f32 %v654_v63, %v1886_v35  ;;  %v669_v16 = vmul.f32 %v652_v0, %v1888_v36  ;;  %p1239_p7 = por %p1238_p4, %p1237_p2 }
 0x150   : > { %v678_v14 = vadd.f32 %v670_v1, %v662_v12  ;;  %v677_v15 = vadd.f32 %v669_v16, %v661_v13  ;;  %p1240_p13 = pnand %p1239_p7, %p1233_p8 }
 0x152   : > { %686 = vst [vmem:[%s1951_s13 + $0x1c] sm:$0xf] %v678_v14  ;;  %685 = vst [vmem:[%s1951_s13 + $0x18] sm:$0xf] %v677_v15 }
 0x153   : > { %1243 = shalt.err (!%p1240_p13)
}
 0x154   : > { %s1244_s24 = scalar_lea.hbm %s1981_s8, 512  ;;  %s1248_s5 = scalar_lea.hbm %s2102_s30, 2048 }
 0x155   : > { %p1245_p10 = scmp.ne.s32.totalorder %s1981_s8, %s1244_s24  ;;  %p1249_p9 = scmp.lt.u32.totalorder %s1981_s8, %s2102_s30 }
 0x156   : > { %p1250_p12 = scmp.lt.u32.totalorder %s1248_s5, %s1244_s24  ;;  %p1252_p0 = scmp.lt.u32.totalorder %s1244_s24, %s1981_s8 }
 0x157   : > { %p1246_p5 = pnand %p1245_p10, %p2101_p11 }
 0x158   : > { %p1251_p6 = por %p1250_p12, %p1249_p9 }
 0x159   : > { %p1247_p3 = pneg %p1246_p5 }
 0x15a   : > { %p1253_p1 = por %p1252_p0, %p1251_p6 }
 0x15c   : > { %p1254_p8 = pnand %p1253_p1, %p1247_p3 }
 0x15e   : > { %1257 = shalt.err (!%p1254_p8)
}
 0x15f   : > { %962 = dma.vmem_to_hbm [thread:$0]  (%p2101_p11), %s1974_s4, 512, %s1981_s8, %s693_s2, %s1376_s6, %s1376_s6, %s1379_s15  }
 0x160 PF: > { %s2103_s12 = sld [smem:[#allocation20_spill]]  ;;  %s2104_s21 = sld [smem:[#allocation19_spill]] }
 0x161   : > { %s2105_s13 = sld [smem:[#allocation25_spill]] }
 0x166   : > { %p986_p2 = scmp.ge.s32.totalorder %s2103_s12, 2  ;;  %s741_s25 = sand.u32 1, %s2104_s21  }
 0x167   : > { %p2106_p4 = scmp.ne.s32.totalorder %s2105_s13, 0  ;;  %s742_s17 = scalar_lea.sflag [#allocation4], %s741_s25 }
 0x169   : > { %p979_p7 = pnand %p986_p2, %p2106_p4 }
 0x16b   : > { %1319 = dma.done.wait (!%p979_p7), %s742_s17, 512  }
 0x16c   : > { %1321 = vsyncadd (!%p979_p7), %s742_s17, 4294966784  ;;  %s751_s10 = scalar_lea.sflag [#allocation12], %s741_s25 }
 0x16d   : > { %1323 = dma.done.wait (!%p979_p7), %s751_s10, 512  }
 0x16e   : > { %1325 = vsyncadd (!%p979_p7), %s751_s10, 4294966784  ;;  %s31_s28 = sadd.s32 1, %s2103_s12   ;;  %s2107_s6 = sld [smem:[#allocation24_spill]] }
 0x16f   : > { %p28_p13 = scmp.ge.s32.totalorder %s31_s28, 6   ;;  %s2108_s15 = sld [smem:[#allocation23_spill]] }
 0x170   : > { %s2109_s4 = sld [smem:[#allocation21_spill]]  ;;  %s2110_s8 = sld [smem:[#allocation22_spill]] }
 0x171   : > { %s2111_s18 = smov %s1332_s19  ;;  %s2112_s19 = smov %s1336_s20 }
 0x172   : > { %s2114_s21 = smov %s1344_s22  ;;  %s2115_s22 = smov %s1348_s23 }
 0x173   : > { %s2117_s24 = smov %s1360_s26  ;;  %s2118_s25 = smov %s1364_s27 }
 0x174   : > { %s2113_s20 = smov %s2107_s6  ;;  %30 = sbr.rel (!%p28_p13) target bundleno = 21 (0x15), region = 135 }
 0x175   : > { %s2116_s23 = smov %s2108_s15 }
 0x176   : > { %s2119_s26 = smov %s2109_s4  ;;  %s2120_s27 = smov %s2110_s8 }
 0x17b   :  { %756 = vsyncpa [#allocation3], 1 }
 0x17c   :  { %758 = vsyncpa [#allocation3 + $0x1], 1 }
 0x17d   :  { %759 = vsyncpa [#allocation6], 1 }
 0x17e   :  { %761 = vsyncpa [#allocation6 + $0x1], 1 }
 0x17f   :  { %762 = vsyncpa [#allocation9], 1 }
 0x180   :  { %764 = vsyncpa [#allocation9 + $0x1], 1 }
 0x181   :  { %765 = vsyncpa [#allocation4], 1 }
 0x182   :  { %767 = vsyncpa [#allocation4 + $0x1], 1 }
 0x183   :  { %768 = vsyncpa [#allocation12], 1 }
 0x184   :  { %770 = vsyncpa [#allocation12 + $0x1], 1 }

</bundles_post_ra>
